<compile_context>
chip_gen: v7x
topology: tpu7x:2x2x1
jax: 0.10.0
libtpu: 0.0.40
codegen_flags: <defaults>
</compile_context>

<pallas_src>
import functools

import jax
import jax.numpy as jnp
import numpy as np
from jax.experimental import pallas as pl
from jax.experimental.pallas import tpu as pltpu


def _dual_match_kernel(seq_len_ref,                 # scalar prefetch: [B] int32 (SMEM)
                       p_ref, q_ref,                # [Bb, P, H], [Bb, Q, H]
                       wt_ref, bt_ref,              # trans_linear: [H, H] (cd), [1, H] f32
                       w1_ref, b1_ref,              # fuse.linear1: [H, H] (cd), [1, H] f32
                       w2_ref, b2_ref,              # fuse.linear2: [H, H] (cd), [1, H] f32
                       wl_ref, bl_ref,              # linear:       [H, H] (cd), [1, H] f32
                       o_ref,                       # [Bb, 1, H]
                       *, compute_dtype):
    g = pl.program_id(0)
    Bb, P, H = p_ref.shape
    Q = q_ref.shape[1]
    cd = compute_dtype

    # Hoisted dtype casts: no-ops when cd == f32, a single downcast each for bf16.
    p_cd = p_ref[...].astype(cd)                    # [Bb, P, H]
    q_cd = q_ref[...].astype(cd)                    # [Bb, Q, H]

    # nn.Linear semantics y = x @ W^T + b: contract the last dim of x with the last
    # dim of the [out, in] weight via dot_general -> no in-kernel weight transpose.
    dn_lin = (((1,), (1,)), ((), ()))
    wt = wt_ref[...]

    # trans_q / trans_p share trans_linear; fold batch into M (Bb*Q / Bb*P rows) so
    # the MXU systolic array is filled and the bias add is amortized.
    q2 = q_cd.reshape(Bb * Q, H)
    p2 = p_cd.reshape(Bb * P, H)
    trans_q = (jax.lax.dot_general(q2, wt, dn_lin,
                                   preferred_element_type=jnp.float32)
               + bt_ref[...]).reshape(Bb, Q, H)       # f32
    trans_p = (jax.lax.dot_general(p2, wt, dn_lin,
                                   preferred_element_type=jnp.float32)
               + bt_ref[...]).reshape(Bb, P, H)       # f32

    # att_weights = proj_p @ trans_q^T  ==  'bph,bqh->bpq' : batched last-dim
    # contraction, no transposed [H, Q] copy materialized.
    dn_att = (((2,), (2,)), ((0,), (0,)))
    att = jax.lax.dot_general(p_cd, trans_q.astype(cd), dn_att,
                              preferred_element_type=jnp.float32)   # [Bb, P, Q] f32

    # masked_softmax, exactly as the PyTorch code: logits are *multiplied* by the
    # mask (masked logits become 0, not -inf), softmaxed, re-masked, renormalized.
    # Per-batch lengths come from the scalar-prefetch SMEM ref.  The mask is built
    # on a small (Bb, Q) slab and broadcast once along the sublane (P) axis.
    col_q = jax.lax.broadcasted_iota(jnp.int32, (Bb, Q), 1)
    bidx_q = jax.lax.broadcasted_iota(jnp.int32, (Bb, Q), 0)
    lens_q = jnp.zeros((Bb, Q), jnp.int32)
    for i in range(Bb):                              # Bb is a small static constant
        lens_q = jnp.where(bidx_q == i, seq_len_ref[g * Bb + i], lens_q)
    mask = jnp.broadcast_to((col_q < lens_q).astype(jnp.float32)[:, None, :],
                            (Bb, P, Q))              # [Bb, P, Q]

    masked = att * mask
    m = jnp.max(masked, axis=-1, keepdims=True)
    e = jnp.exp(masked - m)
    # EUP reciprocal for the softmax denominator (free VLIW slot); its small
    # relative error is a per-row scale that cancels in the renormalization below.
    sm = e * pl.reciprocal(jnp.sum(e, axis=-1, keepdims=True), approx=True)
    sm = sm * mask
    # Final renorm stays an exact divide: keeps the 1e-13 epsilon semantics and
    # tight f32 parity with the PyTorch reference.
    att_norm = sm / (jnp.sum(sm, axis=-1, keepdims=True) + 1e-13)   # [Bb, P, Q] f32

    an = att_norm.astype(cd)

    # att_doc = att_norm @ proj_q  (contract Q) -> [Bb, P, H]; doc_pool = max over P.
    dn_doc = (((2,), (1,)), ((0,), (0,)))
    att_doc = jax.lax.dot_general(an, q_cd, dn_doc,
                                  preferred_element_type=jnp.float32)
    doc_pool = jnp.max(att_doc, axis=1)               # [Bb, H] f32

    # att_ques = att_norm^T @ trans_p  (contract P) -> [Bb, Q, H]; ques_pool = max over Q.
    dn_ques = (((1,), (1,)), ((0,), (0,)))
    att_ques = jax.lax.dot_general(an, trans_p.astype(cd), dn_ques,
                                   preferred_element_type=jnp.float32)
    ques_pool = jnp.max(att_ques, axis=1)             # [Bb, H] f32

    # FuseNet: p = doc_pool, q = ques_pool; mid = sigmoid(linear1(q) + linear2(p)).
    lq = jax.lax.dot_general(ques_pool.astype(cd), w1_ref[...], dn_lin,
                             preferred_element_type=jnp.float32) + b1_ref[...]
    lp = jax.lax.dot_general(doc_pool.astype(cd), w2_ref[...], dn_lin,
                             preferred_element_type=jnp.float32) + b2_ref[...]
    # Exact sigmoid (exp is EUP; one exact divide) so the f32 path tracks the
    # reference to <5e-5 through the gate and the final Linear.
    mid = 1.0 / (1.0 + jnp.exp(-(lq + lp)))
    fuse = doc_pool * mid + ques_pool * (1.0 - mid)   # [Bb, H] f32

    # output = relu(linear(fuse_vec))
    out = jax.lax.dot_general(fuse.astype(cd), wl_ref[...], dn_lin,
                              preferred_element_type=jnp.float32) + bl_ref[...]
    o_ref[...] = jnp.maximum(out, 0.0).reshape(Bb, 1, H).astype(o_ref.dtype)


def _choose_batch_block(B, P, target_rows=256):
    """Largest divisor of B such that Bb*P roughly fills the MXU M dimension."""
    want = min(B, max(1, pl.cdiv(target_rows, P)))
    for bb in range(want, 0, -1):
        if B % bb == 0:
            return bb
    return 1


def dual_match_net(proj_p, proj_q, seq_len,
                   w_trans, b_trans,
                   w_fuse1, b_fuse1, w_fuse2, b_fuse2,
                   w_out, b_out,
                   *, batch_block=None, compute_dtype=jnp.float32):
    """Fused DualMatchNet.forward.  Returns [B, H]."""
    B, P, H = proj_p.shape
    _, Q, _ = proj_q.shape

    Bb = _choose_batch_block(B, P) if batch_block is None else batch_block
    assert B % Bb == 0, "batch_block must divide the batch size"

    cd = compute_dtype
    # Host-side weight cast is free (weights are loaded once, constant index_map);
    # biases stay f32 and are added after the f32-accumulated matmuls.
    weights = [w.astype(cd) for w in (w_trans, w_fuse1, w_fuse2, w_out)]
    biases = [b.reshape(1, H).astype(jnp.float32)
              for b in (b_trans, b_fuse1, b_fuse2, b_out)]

    kernel = functools.partial(_dual_match_kernel, compute_dtype=cd)

    def const_map(g, sl):
        return (0, 0)

    wb_specs = []
    for _ in range(4):
        wb_specs.append(pl.BlockSpec((H, H), const_map))   # weight (VMEM-resident)
        wb_specs.append(pl.BlockSpec((1, H), const_map))   # bias   (VMEM-resident)

    grid_spec = pltpu.PrefetchScalarGridSpec(
        num_scalar_prefetch=1,
        grid=(B // Bb,),
        in_specs=[
            pl.BlockSpec((Bb, P, H), lambda g, sl: (g, 0, 0)),   # proj_p
            pl.BlockSpec((Bb, Q, H), lambda g, sl: (g, 0, 0)),   # proj_q
            *wb_specs,
        ],
        out_specs=pl.BlockSpec((Bb, 1, H), lambda g, sl: (g, 0, 0)),
    )

    itemsize = jnp.dtype(proj_p.dtype).itemsize
    cd_size = jnp.dtype(cd).itemsize
    # Rough per-step working set: double-buffered streamed blocks + resident
    # weights/biases + the main f32 temporaries (trans_*, att/mask/att_norm, att_doc/ques).
    est = (2 * (Bb * P * H + Bb * Q * H + Bb * H) * itemsize
           + 4 * (H * H * cd_size + H * 4)
           + 4 * (2 * Bb * P * H + 2 * Bb * Q * H + 3 * Bb * P * Q))
    vmem_limit = int(min(64 * 1024 * 1024, max(32 * 1024 * 1024, 2 * est)))
    # TODO(synk): for BERT-scale P/Q on v7x (64 MiB VMEM), add a P-tiling grid axis with
    # running-max / att_ques accumulator scratch instead of only raising the VMEM limit.

    cost = pl.CostEstimate(
        flops=int(2 * B * ((P + Q) * H * H + 3 * P * Q * H + 3 * H * H)),
        transcendentals=int(B * (P * Q + H)),
        bytes_accessed=int(itemsize * (B * P * H + B * Q * H + B * H)
                           + cd_size * 4 * H * H + 4 * 4 * H + 4 * B),
    )

    out3 = pl.pallas_call(
        kernel,
        out_shape=jax.ShapeDtypeStruct((B, 1, H), proj_p.dtype),
        grid_spec=grid_spec,
        compiler_params=pltpu.CompilerParams(
            dimension_semantics=("parallel",),
            vmem_limit_bytes=vmem_limit),
        cost_estimate=cost,
    )(seq_len.astype(jnp.int32), proj_p, proj_q,
      weights[0], biases[0], weights[1], biases[1],
      weights[2], biases[2], weights[3], biases[3])

    return out3.reshape(B, H)


def _reference(proj_p, proj_q, seq_len,
               w_trans, b_trans, w_fuse1, b_fuse1, w_fuse2, b_fuse2, w_out, b_out):
    trans_q = proj_q @ w_trans.T + b_trans
    trans_p = proj_p @ w_trans.T + b_trans
    att = jnp.einsum("bph,bqh->bpq", proj_p, trans_q)
    col = jnp.arange(att.shape[-1])[None, None, :]
    mask = (col < seq_len[:, None, None]).astype(att.dtype)
    sm = jax.nn.softmax(att * mask, axis=-1)
    sm = sm * mask
    att_norm = sm / (jnp.sum(sm, axis=-1, keepdims=True) + 1e-13)
    att_doc = jnp.einsum("bpq,bqh->bph", att_norm, proj_q)
    doc_pool = jnp.max(att_doc, axis=1)
    att_ques = jnp.einsum("bpq,bph->bqh", att_norm, trans_p)
    ques_pool = jnp.max(att_ques, axis=1)
    lq = ques_pool @ w_fuse1.T + b_fuse1
    lp = doc_pool @ w_fuse2.T + b_fuse2
    mid = jax.nn.sigmoid(lq + lp)
    fuse = doc_pool * mid + ques_pool * (1.0 - mid)
    return jnp.maximum(fuse @ w_out.T + b_out, 0.0)


if __name__ == "__main__":
    B, P, Q, H = 2, 8, 8, 32

    key = jax.random.PRNGKey(0)
    ks = jax.random.split(key, 10)

    proj_p = jax.random.normal(ks[0], (B, P, H), dtype=jnp.float32)
    proj_q = jax.random.normal(ks[1], (B, Q, H), dtype=jnp.float32)
    seq_len = jnp.array([5, 8], dtype=jnp.int32)

    def lin(kw, kb, n):
        return (jax.random.normal(kw, (n, n), dtype=jnp.float32) * 0.1,
                jax.random.normal(kb, (n,), dtype=jnp.float32) * 0.1)

    w_trans, b_trans = lin(ks[2], ks[3], H)     # trans_linear
    w_fuse1, b_fuse1 = lin(ks[4], ks[5], H)     # fuse.linear1
    w_fuse2, b_fuse2 = lin(ks[6], ks[7], H)     # fuse.linear2
    w_out, b_out = lin(ks[8], ks[9], H)         # linear

    args = (proj_p, proj_q, seq_len,
            w_trans, b_trans, w_fuse1, b_fuse1, w_fuse2, b_fuse2, w_out, b_out)

    ref = _reference(*args)

    # f32 MXU-input path: must match the pure-JAX reference tightly.
    out_f32 = jax.block_until_ready(dual_match_net(*args))
    np.testing.assert_allclose(np.asarray(out_f32), np.asarray(ref),
                               rtol=5e-5, atol=5e-5)

    # bf16 MXU-input path (production setting on v6e/v7x): f32 accumulation and
    # f32 softmax/gate math, so only a loose sanity check against the f32 reference.
    out_bf16 = jax.block_until_ready(
        dual_match_net(*args, compute_dtype=jnp.bfloat16))
    np.testing.assert_allclose(np.asarray(out_bf16), np.asarray(ref),
                               rtol=2e-1, atol=2e-1)

    print("KERNEL_OK")
</pallas_src>

<mosaic_0001>
module attributes {stable_mosaic.version = 11 : i64} {
  func.func @_dual_match_kernel(%arg0: i32, %arg1: memref<2xi32, #tpu.memory_space<smem>>, %arg2: memref<2x8x32xf32, #tpu.memory_space<vmem>>, %arg3: memref<2x8x32xf32, #tpu.memory_space<vmem>>, %arg4: memref<32x32xf32, #tpu.memory_space<vmem>>, %arg5: memref<1x32xf32, #tpu.memory_space<vmem>>, %arg6: memref<32x32xf32, #tpu.memory_space<vmem>>, %arg7: memref<1x32xf32, #tpu.memory_space<vmem>>, %arg8: memref<32x32xf32, #tpu.memory_space<vmem>>, %arg9: memref<1x32xf32, #tpu.memory_space<vmem>>, %arg10: memref<32x32xf32, #tpu.memory_space<vmem>>, %arg11: memref<1x32xf32, #tpu.memory_space<vmem>>, %arg12: memref<2x1x32xf32, #tpu.memory_space<vmem>>) attributes {dimension_semantics = [#tpu.dimension_semantics<parallel>], iteration_bounds = array<i64: 1>, scalar_prefetch = 1 : i64, scratch_operands = 0 : i64, tpu.core_type = #tpu.core_type<tc>, window_params = [{transform_indices = @transform_0, window_bounds = array<i64: 2, 8, 32>}, {transform_indices = @transform_1, window_bounds = array<i64: 2, 8, 32>}, {pipeline_mode = #tpu.pipeline_mode<synchronous>, transform_indices = @transform_2, window_bounds = array<i64: 32, 32>}, {pipeline_mode = #tpu.pipeline_mode<synchronous>, transform_indices = @transform_3, window_bounds = array<i64: 1, 32>}, {pipeline_mode = #tpu.pipeline_mode<synchronous>, transform_indices = @transform_4, window_bounds = array<i64: 32, 32>}, {pipeline_mode = #tpu.pipeline_mode<synchronous>, transform_indices = @transform_5, window_bounds = array<i64: 1, 32>}, {pipeline_mode = #tpu.pipeline_mode<synchronous>, transform_indices = @transform_6, window_bounds = array<i64: 32, 32>}, {pipeline_mode = #tpu.pipeline_mode<synchronous>, transform_indices = @transform_7, window_bounds = array<i64: 1, 32>}, {pipeline_mode = #tpu.pipeline_mode<synchronous>, transform_indices = @transform_8, window_bounds = array<i64: 32, 32>}, {pipeline_mode = #tpu.pipeline_mode<synchronous>, transform_indices = @transform_9, window_bounds = array<i64: 1, 32>}, {transform_indices = @transform_10, window_bounds = array<i64: 2, 1, 32>}]} {
    %c0 = arith.constant 0 : index
    %c0_0 = arith.constant 0 : index
    %c0_1 = arith.constant 0 : index
    %0 = vector.load %arg2[%c0, %c0_0, %c0_1] : memref<2x8x32xf32, #tpu.memory_space<vmem>>, vector<2x8x32xf32>
    %c0_2 = arith.constant 0 : index
    %c0_3 = arith.constant 0 : index
    %c0_4 = arith.constant 0 : index
    %1 = vector.load %arg3[%c0_2, %c0_3, %c0_4] : memref<2x8x32xf32, #tpu.memory_space<vmem>>, vector<2x8x32xf32>
    %c0_5 = arith.constant 0 : index
    %c0_6 = arith.constant 0 : index
    %2 = vector.load %arg4[%c0_5, %c0_6] : memref<32x32xf32, #tpu.memory_space<vmem>>, vector<32x32xf32>
    %3 = vector.shape_cast %1 : vector<2x8x32xf32> to vector<16x32xf32>
    %4 = vector.shape_cast %0 : vector<2x8x32xf32> to vector<16x32xf32>
    %cst = arith.constant dense<0.000000e+00> : vector<16x32xf32>
    %5 = tpu.matmul %3, %2, %cst {dimension_numbers = #tpu.dot_dimension_numbers<[1], [1], [0], [0], [0, 0, 1, 0], [], []>} : vector<16x32xf32>, vector<32x32xf32>, vector<16x32xf32> -> vector<16x32xf32>
    %c0_7 = arith.constant 0 : index
    %c0_8 = arith.constant 0 : index
    %6 = vector.load %arg5[%c0_7, %c0_8] : memref<1x32xf32, #tpu.memory_space<vmem>>, vector<1x32xf32>
    %7 = vector.broadcast %6 : vector<1x32xf32> to vector<16x32xf32>
    %8 = arith.addf %5, %7 : vector<16x32xf32>
    %9 = vector.shape_cast %8 : vector<16x32xf32> to vector<2x8x32xf32>
    %cst_9 = arith.constant dense<0.000000e+00> : vector<16x32xf32>
    %10 = tpu.matmul %4, %2, %cst_9 {dimension_numbers = #tpu.dot_dimension_numbers<[1], [1], [0], [0], [0, 0, 1, 0], [], []>} : vector<16x32xf32>, vector<32x32xf32>, vector<16x32xf32> -> vector<16x32xf32>
    %c0_10 = arith.constant 0 : index
    %c0_11 = arith.constant 0 : index
    %11 = vector.load %arg5[%c0_10, %c0_11] : memref<1x32xf32, #tpu.memory_space<vmem>>, vector<1x32xf32>
    %12 = vector.broadcast %11 : vector<1x32xf32> to vector<16x32xf32>
    %13 = arith.addf %10, %12 : vector<16x32xf32>
    %14 = vector.shape_cast %13 : vector<16x32xf32> to vector<2x8x32xf32>
    %cst_12 = arith.constant dense<0.000000e+00> : vector<2x8x8xf32>
    %15 = tpu.matmul %0, %9, %cst_12 {dimension_numbers = #tpu.dot_dimension_numbers<[2], [2], [1], [1], [0, 0, 0, 1, 1, 1], [0], [0]>} : vector<2x8x32xf32>, vector<2x8x32xf32>, vector<2x8x8xf32> -> vector<2x8x8xf32>
    %16 = tpu.iota {dimensions = array<i32: 1>} : vector<2x8xi32>
    %17 = tpu.iota {dimensions = array<i32: 0>} : vector<2x8xi32>
    %c0_i32 = arith.constant 0 : i32
    %18 = vector.broadcast %c0_i32 : i32 to vector<2x8xi32>
    %c0_i32_13 = arith.constant 0 : i32
    %19 = vector.broadcast %c0_i32_13 : i32 to vector<2x8xi32>
    %20 = arith.cmpi eq, %17, %19 : vector<2x8xi32>
    %c2_i32 = arith.constant 2 : i32
    %21 = arith.muli %arg0, %c2_i32 : i32
    %c0_i32_14 = arith.constant 0 : i32
    %22 = arith.addi %21, %c0_i32_14 : i32
    %23 = arith.index_cast %22 : i32 to index
    %24 = memref.load %arg1[%23] : memref<2xi32, #tpu.memory_space<smem>>
    %25 = vector.broadcast %24 : i32 to vector<2x8xi32>
    %26 = arith.select %20, %25, %18 : vector<2x8xi1>, vector<2x8xi32>
    %c1_i32 = arith.constant 1 : i32
    %27 = vector.broadcast %c1_i32 : i32 to vector<2x8xi32>
    %28 = arith.cmpi eq, %17, %27 : vector<2x8xi32>
    %c2_i32_15 = arith.constant 2 : i32
    %29 = arith.muli %arg0, %c2_i32_15 : i32
    %c1_i32_16 = arith.constant 1 : i32
    %30 = arith.addi %29, %c1_i32_16 : i32
    %31 = arith.index_cast %30 : i32 to index
    %32 = memref.load %arg1[%31] : memref<2xi32, #tpu.memory_space<smem>>
    %33 = vector.broadcast %32 : i32 to vector<2x8xi32>
    %34 = arith.select %28, %33, %26 : vector<2x8xi1>, vector<2x8xi32>
    %35 = arith.cmpi slt, %16, %34 : vector<2x8xi32>
    %36 = arith.extui %35 : vector<2x8xi1> to vector<2x8xi32>
    %37 = arith.sitofp %36 : vector<2x8xi32> to vector<2x8xf32>
    %38 = vector.shape_cast %37 : vector<2x8xf32> to vector<2x1x8xf32>
    %39 = vector.shape_cast %38 : vector<2x1x8xf32> to vector<2x1x8xf32>
    %40 = vector.broadcast %39 : vector<2x1x8xf32> to vector<2x8x8xf32>
    %41 = arith.mulf %15, %40 : vector<2x8x8xf32>
    %cst_17 = arith.constant dense<0xFF800000> : vector<2x8xf32>
    %42 = vector.multi_reduction <maximumf>, %41, %cst_17 [2] : vector<2x8x8xf32> to vector<2x8xf32>
    %43 = vector.shape_cast %42 : vector<2x8xf32> to vector<2x8x1xf32>
    %44 = vector.broadcast %43 : vector<2x8x1xf32> to vector<2x8x8xf32>
    %45 = arith.subf %41, %44 : vector<2x8x8xf32>
    %46 = math.exp %45 : vector<2x8x8xf32>
    %cst_18 = arith.constant dense<0.000000e+00> : vector<2x8xf32>
    %47 = vector.multi_reduction <add>, %46, %cst_18 [2] : vector<2x8x8xf32> to vector<2x8xf32>
    %48 = vector.shape_cast %47 : vector<2x8xf32> to vector<2x8x1xf32>
    %49 = tpu.reciprocal %48 {approx = true} : vector<2x8x1xf32> -> vector<2x8x1xf32>
    %50 = vector.broadcast %49 : vector<2x8x1xf32> to vector<2x8x8xf32>
    %51 = arith.mulf %46, %50 : vector<2x8x8xf32>
    %52 = arith.mulf %51, %40 : vector<2x8x8xf32>
    %cst_19 = arith.constant dense<0.000000e+00> : vector<2x8xf32>
    %53 = vector.multi_reduction <add>, %52, %cst_19 [2] : vector<2x8x8xf32> to vector<2x8xf32>
    %54 = vector.shape_cast %53 : vector<2x8xf32> to vector<2x8x1xf32>
    %cst_20 = arith.constant 9.99999982E-14 : f32
    %55 = vector.broadcast %cst_20 : f32 to vector<2x8x1xf32>
    %56 = arith.addf %54, %55 : vector<2x8x1xf32>
    %57 = vector.broadcast %56 : vector<2x8x1xf32> to vector<2x8x8xf32>
    %58 = arith.divf %52, %57 : vector<2x8x8xf32>
    %cst_21 = arith.constant dense<0.000000e+00> : vector<2x8x32xf32>
    %59 = tpu.matmul %58, %1, %cst_21 {dimension_numbers = #tpu.dot_dimension_numbers<[2], [1], [1], [2], [0, 0, 0, 1, 1, 2], [0], [0]>} : vector<2x8x8xf32>, vector<2x8x32xf32>, vector<2x8x32xf32> -> vector<2x8x32xf32>
    %cst_22 = arith.constant dense<0xFF800000> : vector<2x32xf32>
    %60 = vector.multi_reduction <maximumf>, %59, %cst_22 [1] : vector<2x8x32xf32> to vector<2x32xf32>
    %cst_23 = arith.constant dense<0.000000e+00> : vector<2x8x32xf32>
    %61 = tpu.matmul %58, %14, %cst_23 {dimension_numbers = #tpu.dot_dimension_numbers<[1], [1], [2], [2], [0, 0, 0, 2, 1, 2], [0], [0]>} : vector<2x8x8xf32>, vector<2x8x32xf32>, vector<2x8x32xf32> -> vector<2x8x32xf32>
    %cst_24 = arith.constant dense<0xFF800000> : vector<2x32xf32>
    %62 = vector.multi_reduction <maximumf>, %61, %cst_24 [1] : vector<2x8x32xf32> to vector<2x32xf32>
    %c0_25 = arith.constant 0 : index
    %c0_26 = arith.constant 0 : index
    %63 = vector.load %arg6[%c0_25, %c0_26] : memref<32x32xf32, #tpu.memory_space<vmem>>, vector<32x32xf32>
    %cst_27 = arith.constant dense<0.000000e+00> : vector<2x32xf32>
    %64 = tpu.matmul %62, %63, %cst_27 {dimension_numbers = #tpu.dot_dimension_numbers<[1], [1], [0], [0], [0, 0, 1, 0], [], []>} : vector<2x32xf32>, vector<32x32xf32>, vector<2x32xf32> -> vector<2x32xf32>
    %c0_28 = arith.constant 0 : index
    %c0_29 = arith.constant 0 : index
    %65 = vector.load %arg7[%c0_28, %c0_29] : memref<1x32xf32, #tpu.memory_space<vmem>>, vector<1x32xf32>
    %66 = vector.broadcast %65 : vector<1x32xf32> to vector<2x32xf32>
    %67 = arith.addf %64, %66 : vector<2x32xf32>
    %c0_30 = arith.constant 0 : index
    %c0_31 = arith.constant 0 : index
    %68 = vector.load %arg8[%c0_30, %c0_31] : memref<32x32xf32, #tpu.memory_space<vmem>>, vector<32x32xf32>
    %cst_32 = arith.constant dense<0.000000e+00> : vector<2x32xf32>
    %69 = tpu.matmul %60, %68, %cst_32 {dimension_numbers = #tpu.dot_dimension_numbers<[1], [1], [0], [0], [0, 0, 1, 0], [], []>} : vector<2x32xf32>, vector<32x32xf32>, vector<2x32xf32> -> vector<2x32xf32>
    %c0_33 = arith.constant 0 : index
    %c0_34 = arith.constant 0 : index
    %70 = vector.load %arg9[%c0_33, %c0_34] : memref<1x32xf32, #tpu.memory_space<vmem>>, vector<1x32xf32>
    %71 = vector.broadcast %70 : vector<1x32xf32> to vector<2x32xf32>
    %72 = arith.addf %69, %71 : vector<2x32xf32>
    %73 = arith.addf %67, %72 : vector<2x32xf32>
    %cst_35 = arith.constant 0.000000e+00 : f32
    %74 = vector.broadcast %cst_35 : f32 to vector<2x32xf32>
    %75 = arith.subf %74, %73 : vector<2x32xf32>
    %76 = math.exp %75 : vector<2x32xf32>
    %cst_36 = arith.constant 1.000000e+00 : f32
    %77 = vector.broadcast %cst_36 : f32 to vector<2x32xf32>
    %78 = arith.addf %77, %76 : vector<2x32xf32>
    %cst_37 = arith.constant 1.000000e+00 : f32
    %79 = vector.broadcast %cst_37 : f32 to vector<2x32xf32>
    %80 = arith.divf %79, %78 : vector<2x32xf32>
    %81 = arith.mulf %60, %80 : vector<2x32xf32>
    %cst_38 = arith.constant 1.000000e+00 : f32
    %82 = vector.broadcast %cst_38 : f32 to vector<2x32xf32>
    %83 = arith.subf %82, %80 : vector<2x32xf32>
    %84 = arith.mulf %62, %83 : vector<2x32xf32>
    %85 = arith.addf %81, %84 : vector<2x32xf32>
    %c0_39 = arith.constant 0 : index
    %c0_40 = arith.constant 0 : index
    %86 = vector.load %arg10[%c0_39, %c0_40] : memref<32x32xf32, #tpu.memory_space<vmem>>, vector<32x32xf32>
    %cst_41 = arith.constant dense<0.000000e+00> : vector<2x32xf32>
    %87 = tpu.matmul %85, %86, %cst_41 {dimension_numbers = #tpu.dot_dimension_numbers<[1], [1], [0], [0], [0, 0, 1, 0], [], []>} : vector<2x32xf32>, vector<32x32xf32>, vector<2x32xf32> -> vector<2x32xf32>
    %c0_42 = arith.constant 0 : index
    %c0_43 = arith.constant 0 : index
    %88 = vector.load %arg11[%c0_42, %c0_43] : memref<1x32xf32, #tpu.memory_space<vmem>>, vector<1x32xf32>
    %89 = vector.broadcast %88 : vector<1x32xf32> to vector<2x32xf32>
    %90 = arith.addf %87, %89 : vector<2x32xf32>
    %cst_44 = arith.constant 0.000000e+00 : f32
    %91 = vector.broadcast %cst_44 : f32 to vector<2x32xf32>
    %92 = arith.maximumf %90, %91 : vector<2x32xf32>
    %93 = vector.shape_cast %92 : vector<2x32xf32> to vector<2x1x32xf32>
    %c0_45 = arith.constant 0 : index
    %c0_46 = arith.constant 0 : index
    %c0_47 = arith.constant 0 : index
    %94 = vector.load %arg12[%c0_45, %c0_46, %c0_47] : memref<2x1x32xf32, #tpu.memory_space<vmem>>, vector<2x1x32xf32>
    tpu.vector_store %arg12[%c0_45, %c0_46, %c0_47], %93 {strides = array<i32>} : memref<2x1x32xf32, #tpu.memory_space<vmem>>, vector<2x1x32xf32>,
    return
  }
  func.func @transform_0(%arg0: i32, %arg1: memref<2xi32, #tpu.memory_space<smem>>) -> (i32, i32, i32) {
    %c0_i32 = arith.constant 0 : i32
    %c0_i32_0 = arith.constant 0 : i32
    %c0_i32_1 = arith.constant 0 : i32
    return %arg0, %c0_i32, %c0_i32_0 : i32, i32, i32
  }
  func.func @transform_1(%arg0: i32, %arg1: memref<2xi32, #tpu.memory_space<smem>>) -> (i32, i32, i32) {
    %c0_i32 = arith.constant 0 : i32
    %c0_i32_0 = arith.constant 0 : i32
    %c0_i32_1 = arith.constant 0 : i32
    return %arg0, %c0_i32, %c0_i32_0 : i32, i32, i32
  }
  func.func @transform_2(%arg0: i32, %arg1: memref<2xi32, #tpu.memory_space<smem>>) -> (i32, i32) {
    %c0_i32 = arith.constant 0 : i32
    %c0_i32_0 = arith.constant 0 : i32
    %c0_i32_1 = arith.constant 0 : i32
    return %c0_i32, %c0_i32_0 : i32, i32
  }
  func.func @transform_3(%arg0: i32, %arg1: memref<2xi32, #tpu.memory_space<smem>>) -> (i32, i32) {
    %c0_i32 = arith.constant 0 : i32
    %c0_i32_0 = arith.constant 0 : i32
    %c0_i32_1 = arith.constant 0 : i32
    return %c0_i32, %c0_i32_0 : i32, i32
  }
  func.func @transform_4(%arg0: i32, %arg1: memref<2xi32, #tpu.memory_space<smem>>) -> (i32, i32) {
    %c0_i32 = arith.constant 0 : i32
    %c0_i32_0 = arith.constant 0 : i32
    %c0_i32_1 = arith.constant 0 : i32
    return %c0_i32, %c0_i32_0 : i32, i32
  }
  func.func @transform_5(%arg0: i32, %arg1: memref<2xi32, #tpu.memory_space<smem>>) -> (i32, i32) {
    %c0_i32 = arith.constant 0 : i32
    %c0_i32_0 = arith.constant 0 : i32
    %c0_i32_1 = arith.constant 0 : i32
    return %c0_i32, %c0_i32_0 : i32, i32
  }
  func.func @transform_6(%arg0: i32, %arg1: memref<2xi32, #tpu.memory_space<smem>>) -> (i32, i32) {
    %c0_i32 = arith.constant 0 : i32
    %c0_i32_0 = arith.constant 0 : i32
    %c0_i32_1 = arith.constant 0 : i32
    return %c0_i32, %c0_i32_0 : i32, i32
  }
  func.func @transform_7(%arg0: i32, %arg1: memref<2xi32, #tpu.memory_space<smem>>) -> (i32, i32) {
    %c0_i32 = arith.constant 0 : i32
    %c0_i32_0 = arith.constant 0 : i32
    %c0_i32_1 = arith.constant 0 : i32
    return %c0_i32, %c0_i32_0 : i32, i32
  }
  func.func @transform_8(%arg0: i32, %arg1: memref<2xi32, #tpu.memory_space<smem>>) -> (i32, i32) {
    %c0_i32 = arith.constant 0 : i32
    %c0_i32_0 = arith.constant 0 : i32
    %c0_i32_1 = arith.constant 0 : i32
    return %c0_i32, %c0_i32_0 : i32, i32
  }
  func.func @transform_9(%arg0: i32, %arg1: memref<2xi32, #tpu.memory_space<smem>>) -> (i32, i32) {
    %c0_i32 = arith.constant 0 : i32
    %c0_i32_0 = arith.constant 0 : i32
    %c0_i32_1 = arith.constant 0 : i32
    return %c0_i32, %c0_i32_0 : i32, i32
  }
  func.func @transform_10(%arg0: i32, %arg1: memref<2xi32, #tpu.memory_space<smem>>) -> (i32, i32, i32) {
    %c0_i32 = arith.constant 0 : i32
    %c0_i32_0 = arith.constant 0 : i32
    %c0_i32_1 = arith.constant 0 : i32
    return %arg0, %c0_i32, %c0_i32_0 : i32, i32, i32
  }
}

</mosaic_0001>

<bundles_post_ra>
// kernel: tpu_custom_call.1
= control target key start
LH: loop header
LB: loop body
LE: loop exit
PB: predicated region body
PF: predicated region fallthrough
CT: control target
= control target key end

     0   :  { %s2052_s0 = inlined_call_operand.hbm [shape: s32[2], index: 0, kind: input, shape index: {}]   ;;  %s2053_s1 = inlined_call_operand.hbm [shape: f32[2,8,32], index: 1, kind: input, shape index: {}]   ;;  %s2054_s2 = inlined_call_operand.hbm [shape: f32[2,8,32], index: 2, kind: input, shape index: {}]   ;;  %s2055_s3 = inlined_call_operand.hbm [shape: f32[32,32], index: 3, kind: input, shape index: {}]   ;;  %s2056_s4 = inlined_call_operand.vmem [shape: f32[1,32], index: 4, kind: input, shape index: {}]   ;;  %s2057_s5 = inlined_call_operand.hbm [shape: f32[32,32], index: 5, kind: input, shape index: {}]   ;;  %s2058_s6 = inlined_call_operand.vmem [shape: f32[1,32], index: 6, kind: input, shape index: {}]   ;;  %s2059_s7 = inlined_call_operand.hbm [shape: f32[32,32], index: 7, kind: input, shape index: {}]   ;;  %s2060_s8 = inlined_call_operand.hbm [shape: f32[1,32], index: 8, kind: input, shape index: {}]   ;;  %s2061_s9 = inlined_call_operand.vmem [shape: f32[32,32], index: 9, kind: input, shape index: {}]   ;;  %s2062_s10 = inlined_call_operand.vmem [shape: f32[1,32], index: 10, kind: input, shape index: {}]   ;;  %s2063_s11 = inlined_call_operand.hbm [shape: f32[2,1,32], index: 11, kind: output, shape index: {}]  }
   0x1   :  { %s1546_s19 = scalar_lea.hbm %s2052_s0, 16 }
   0x2   :  { %p1547_p0 = scmp.ne.s32.totalorder %s2052_s0, %s1546_s19  ;;  %p1550_p1 = scmp.lt.u32.totalorder %s1546_s19, %s2052_s0 }
   0x4   :  { %p1552_p2 = pnand %p1550_p1, %p1547_p0 }
   0x6   :  { %1555 = shalt.err (!%p1552_p2)  }
   0x7   :  { %s1722_s24 = smov [#allocation3]  }
   0x8   :  { %17 = dma.hbm_to_smem %s2052_s0, 16, %s1722_s24, [#allocation2] }
   0x9   :  { %1710 = dma.done.wait [#allocation2], 16 }
   0xa   :  { %1711 = vsyncadd [#allocation2], 4294967280 }
   0xb   :  { %19 = sfence }
   0xc   :  { %20 = vsyncpa [#allocation5], 0 }
   0xd   :  { %21 = vsyncpa [#allocation8], 0 }
   0xe   :  { %22 = vsyncpa [#allocation11], 0 }
   0xf   :  { %23 = vsyncpa [#allocation14], 0 }
  0x10   :  { %24 = vsyncpa [#allocation6], 0  ;;  %s1723_s27 = smov [#allocation7]   ;;  %s1724_s29 = smov [#allocation10]  }
  0x11   :  { %s42_s28 = sshll.u32 %s1723_s27, 4  ;;  %s68_s30 = sshll.u32 %s1724_s29, 4  ;;  %s43_s28 = int_to_ptr.vmem [resolvable:$true] %s42_s28  ;;  %s1810_s30 = int_to_ptr.vmem [resolvable:$true] %s68_s30 }
  0x12   :  { %s1556_s14 = scalar_lea.hbm %s2054_s2, 256 }
  0x13   :  { %p1557_p3 = scmp.ne.s32.totalorder %s2054_s2, %s1556_s14  ;;  %p1560_p4 = scmp.lt.u32.totalorder %s1556_s14, %s2054_s2 }
  0x15   :  { %p1562_p5 = pnand %p1560_p4, %p1557_p3 }
  0x17   :  { %1565 = shalt.err (!%p1562_p5)
}
  0x18   :  { %s1566_s18 = scalar_lea.vmem %s43_s28, 256  ;;  %p1571_p7 = scmp.lt.s32.totalorder %s43_s28, %s43_s28 }
  0x19   :  { %p1567_p6 = scmp.ne.s32.totalorder %s43_s28, %s1566_s18  ;;  %p1572_p8 = scmp.lt.s32.totalorder %s1566_s18, %s1566_s18 }
  0x1b   :  { %p1573_p9 = por %p1572_p8, %p1571_p7 }
  0x1d   :  { %p1574_p10 = pnand %p1573_p9, %p1567_p6 }
  0x1f   :  { %1577 = shalt.err (!%p1574_p10)
}
  0x20   :  { %s1725_s19 = smov 128   ;;  %s1726_s20 = smov 8  }
  0x21   :  { %48 = dma.hbm_to_vmem [thread:$0]  %s2054_s2, 256, %s43_s28, [#allocation8], %s1725_s19, %s1725_s19, %s1726_s20  }
  0x22   :  { %s1578_s25 = scalar_lea.hbm %s2057_s5, 512 }
  0x23   :  { %p1579_p11 = scmp.ne.s32.totalorder %s2057_s5, %s1578_s25  ;;  %p1582_p12 = scmp.lt.u32.totalorder %s1578_s25, %s2057_s5 }
  0x25   :  { %p1584_p13 = pnand %p1582_p12, %p1579_p11 }
  0x27   :  { %1587 = shalt.err (!%p1584_p13)
}
  0x28   :  { %s1588_s13 = scalar_lea.vmem %s1810_s30, 512  ;;  %p1593_p1 = scmp.lt.s32.totalorder %s1810_s30, %s1810_s30 }
  0x29   :  { %p1589_p0 = scmp.ne.s32.totalorder %s1810_s30, %s1588_s13  ;;  %p1594_p2 = scmp.lt.s32.totalorder %s1588_s13, %s1588_s13 }
  0x2b   :  { %p1595_p3 = por %p1594_p2, %p1593_p1 }
  0x2d   :  { %p1596_p4 = pnand %p1595_p3, %p1589_p0 }
  0x2f   :  { %1599 = shalt.err (!%p1596_p4)
}
  0x30   :  { %74 = dma.hbm_to_vmem [thread:$0]  %s2057_s5, 512, %s1810_s30, [#allocation11], %s1725_s19, %s1725_s19, %s1726_s20  }
  0x31   :  { %s1727_s14 = smov [#allocation4]   ;;  %s1728_s15 = smov [#allocation9]  }
  0x32   :  { %s30_s0 = sshll.u32 %s1727_s14, 4  ;;  %s54_s16 = sshll.u32 %s1728_s15, 4  ;;  %s31_s0 = int_to_ptr.vmem [resolvable:$true] %s30_s0  ;;  %s1847_s16 = int_to_ptr.vmem [resolvable:$true] %s54_s16 }
  0x33   :  { %s1600_s21 = scalar_lea.hbm %s2053_s1, 256 }
  0x34   :  { %p1601_p5 = scmp.ne.s32.totalorder %s2053_s1, %s1600_s21  ;;  %p1604_p6 = scmp.lt.u32.totalorder %s1600_s21, %s2053_s1 }
  0x36   :  { %p1606_p7 = pnand %p1604_p6, %p1601_p5 }
  0x38   :  { %1609 = shalt.err (!%p1606_p7)
}
  0x39   :  { %s1610_s5 = scalar_lea.vmem %s31_s0, 256  ;;  %p1615_p9 = scmp.lt.s32.totalorder %s31_s0, %s31_s0 }
  0x3a   :  { %p1611_p8 = scmp.ne.s32.totalorder %s31_s0, %s1610_s5  ;;  %p1616_p10 = scmp.lt.s32.totalorder %s1610_s5, %s1610_s5 }
  0x3c   :  { %p1617_p11 = por %p1616_p10, %p1615_p9 }
  0x3e   :  { %p1618_p12 = pnand %p1617_p11, %p1611_p8 }
  0x40   :  { %1621 = shalt.err (!%p1618_p12)
}
  0x41   :  { %36 = dma.hbm_to_vmem [thread:$0]  %s2053_s1, 256, %s31_s0, [#allocation5], %s1725_s19, %s1725_s19, %s1726_s20  }
  0x42   :  { %s1622_s12 = scalar_lea.hbm %s2055_s3, 512 }
  0x43   :  { %p1623_p13 = scmp.ne.s32.totalorder %s2055_s3, %s1622_s12  ;;  %p1626_p0 = scmp.lt.u32.totalorder %s1622_s12, %s2055_s3 }
  0x45   :  { %p1628_p1 = pnand %p1626_p0, %p1623_p13 }
  0x47   :  { %1631 = shalt.err (!%p1628_p1)
}
  0x48   :  { %s1632_s15 = scalar_lea.vmem %s1847_s16, 512  ;;  %p1637_p3 = scmp.lt.s32.totalorder %s1847_s16, %s1847_s16 }
  0x49   :  { %p1633_p2 = scmp.ne.s32.totalorder %s1847_s16, %s1632_s15  ;;  %p1638_p4 = scmp.lt.s32.totalorder %s1632_s15, %s1632_s15 }
  0x4b   :  { %p1639_p5 = por %p1638_p4, %p1637_p3 }
  0x4d   :  { %p1640_p6 = pnand %p1639_p5, %p1633_p2 }
  0x4f   :  { %1643 = shalt.err (!%p1640_p6)
}
  0x50   :  { %60 = dma.hbm_to_vmem [thread:$0]  %s2055_s3, 512, %s1847_s16, [#allocation8], %s1725_s19, %s1725_s19, %s1726_s20  }
  0x51   :  { %s1729_s17 = smov [#allocation12]   ;;  %s1730_s21 = smov [#allocation13]  }
  0x52   :  { %s82_s18 = sshll.u32 %s1729_s17, 4  ;;  %s95_s22 = sshll.u32 %s1730_s21, 4  ;;  %s83_s18 = int_to_ptr.vmem [resolvable:$true] %s82_s18  ;;  %s96_s22 = int_to_ptr.vmem [resolvable:$true] %s95_s22 }
  0x53   :  { %s1644_s25 = scalar_lea.hbm %s2059_s7, 512 }
  0x54   :  { %p1645_p7 = scmp.ne.s32.totalorder %s2059_s7, %s1644_s25  ;;  %p1648_p8 = scmp.lt.u32.totalorder %s1644_s25, %s2059_s7 }
  0x56   :  { %p1650_p9 = pnand %p1648_p8, %p1645_p7 }
  0x58   :  { %1653 = shalt.err (!%p1650_p9)
}
  0x59   :  { %s1654_s3 = scalar_lea.vmem %s83_s18, 512  ;;  %p1659_p11 = scmp.lt.s32.totalorder %s83_s18, %s83_s18 }
  0x5a   :  { %p1655_p10 = scmp.ne.s32.totalorder %s83_s18, %s1654_s3  ;;  %p1660_p12 = scmp.lt.s32.totalorder %s1654_s3, %s1654_s3 }
  0x5c   :  { %p1661_p13 = por %p1660_p12, %p1659_p11 }
  0x5e   :  { %p1662_p0 = pnand %p1661_p13, %p1655_p10 }
  0x60   :  { %1665 = shalt.err (!%p1662_p0)
}
  0x61   :  { %88 = dma.hbm_to_vmem [thread:$0]  %s2059_s7, 512, %s83_s18, [#allocation11], %s1725_s19, %s1725_s19, %s1726_s20  }
  0x62   :  { %s1666_s2 = scalar_lea.hbm %s2060_s8, 16 }
  0x63   :  { %p1667_p1 = scmp.ne.s32.totalorder %s2060_s8, %s1666_s2  ;;  %p1670_p2 = scmp.lt.u32.totalorder %s1666_s2, %s2060_s8 }
  0x65   :  { %p1672_p3 = pnand %p1670_p2, %p1667_p1 }
  0x67   :  { %1675 = shalt.err (!%p1672_p3)
}
  0x68   :  { %s1676_s0 = scalar_lea.vmem %s96_s22, 16  ;;  %s1680_s17 = scalar_lea.vmem %s96_s22, 32 }
  0x69   :  { %p1677_p4 = scmp.ne.s32.totalorder %s96_s22, %s1676_s0  ;;  %p1681_p5 = scmp.lt.s32.totalorder %s96_s22, %s96_s22 }
  0x6a   :  { %p1682_p6 = scmp.lt.s32.totalorder %s1680_s17, %s1676_s0 }
  0x6c   :  { %p1683_p7 = por %p1682_p6, %p1681_p5 }
  0x6e   :  { %p1684_p8 = pnand %p1683_p7, %p1677_p4 }
  0x70   :  { %1687 = shalt.err (!%p1684_p8)
}
  0x71   :  { %98 = dma.hbm_to_vmem [thread:$0]  %s2060_s8, 16, %s96_s22, [#allocation14]  }
  0x72   :  { %1712 = dma.done.wait [#allocation5], 256  }
  0x73   :  { %1713 = vsyncadd [#allocation5], 4294967040 }
  0x74   :  { %1714 = dma.done.wait [#allocation8], 768  }
  0x75   :  { %1715 = vsyncadd [#allocation8], 4294966528 }
  0x76   :  { %1716 = dma.done.wait [#allocation11], 1024  }
  0x77   :  { %1717 = vsyncadd [#allocation11], 4294966272 }
  0x78   :  { %1718 = dma.done.wait [#allocation14], 16  }
  0x79   :  { %1719 = vsyncadd [#allocation14], 4294967280  ;;  %vm136_vm0 = vcmask 261120   ;;  %v125_v1 = vld [vmem:[#allocation9] sm:$0xff]  ;;  %v126_v2 = vld [vmem:[#allocation9 + $0x8] sm:$0xff]  ;;  %v1731_v11 = vmov 0.0   ;;  %v457_v20 = vlaneseq }
  0x7a   :  { %vm1913_vm1 = vmpackc.low %vm136_vm0, %vm136_vm0  ;;  %v127_v3 = vld [vmem:[#allocation9 + $0x10] sm:$0xff]  ;;  %v1462_v4 = vpack.c.bf16 %v126_v2, %v125_v1  ;;  %v128_v5 = vld [vmem:[#allocation9 + $0x18] sm:$0xff]  ;;  %vm1732_vm2 = vmmov 0   ;;  %s1314_s18 = sld [smem:[#allocation3 + $0x1]]  ;;  %v1733_v25 = vmov 1966171168  }
  0x7b   :  { %v123_v6 = vld [vmem:[#allocation7] sm:$0xff]  ;;  %v1468_v7 = vpack.c.bf16 %v128_v5, %v127_v3  ;;  %v1934_v8 = vld [vmem:[#allocation7 + $0x8] sm:$0xff]  ;;  %v121_v9 = vld [vmem:[#allocation4] sm:$0xff]  ;;  %v460_v21 = vshrl.u32 %v457_v20, 7  ;;  %v476_v26 = vunpack.c.l.s4 %v1733_v25  ;;  %v458_v27 = vand.u32 127, %v457_v20  ;;  %s1735_s16 = smov [#allocation15]  }
  0x7c   :  { %1385 = vmatprep.mubr.msk.f32.mxu0 %vm136_vm0, %v123_v6  ;;  %1464 = vmatprep.subr.msk.bf16.mxu0 %vm1913_vm1, %v1462_v4  ;;  %v122_v10 = vld [vmem:[#allocation4 + $0x8] sm:$0xff]  ;;  %v1949_v12 = vld [vmem:[%s2056_s4] ss:$0 sm:$0xff]  ;;  %s463_s4 = sld [smem:[#allocation3]]  ;;  %vm509_vm6 = vcmask 64512   ;;  %v933_v25 = vld [vmem:[#allocation10 + $0x18] sm:$0xff] }
  0x7d   :  { %1476 = vmatprep.subr.msk.bf16.mxu1 %vm1913_vm1, %v1462_v4  ;;  %1467 = vmatpush3.bf16.xpose.msk.msra.mxu0 %vm1913_vm1, %v1462_v4  ;;  %vm461_vm3 = vcmp.eq.s32.totalorder %v460_v21, 0  ;;  %vm466_vm4 = vcmp.eq.s32.totalorder %v460_v21, 1  ;;  %v477_v29 = vunpack.c.0.s8 %v476_v26  ;;  %v499_v34 = vsub.s32 0, %v460_v21  ;;  %s1282_s29 = sshll.u32 %s1735_s16, 4  ;;  %s1283_s29 = int_to_ptr.vmem [resolvable:$true] %s1282_s29 }
  0x7e   :  { %1479 = vmatpush3.bf16.xpose.msk.msra.mxu1 %vm1913_vm1, %v1462_v4  ;;  %1470 = vmatprep.subr.msk.bf16.mxu0 %vm1913_vm1, %v1468_v7  ;;  %vm943_vm7 = vcmask 1041409   ;;  %vm1274_vm8 = vcmask 253952   ;;  %s1688_s12 = scalar_lea.vmem %s1283_s29, 32  ;;  %p1693_p10 = scmp.lt.s32.totalorder %s1283_s29, %s1283_s29 }
  0x7f   :  { %1482 = vmatprep.subr.msk.bf16.mxu1 %vm1913_vm1, %v1468_v7  ;;  %1396 = vmatprep.mubr.msk.f32.mxu1 %vm136_vm0, %v121_v9  ;;  %v1967_v30 = vsub.s32 %v477_v29, %v460_v21  ;;  %p1689_p9 = scmp.ne.s32.totalorder %s1283_s29, %s1688_s12  ;;  %p1694_p11 = scmp.lt.s32.totalorder %s1688_s12, %s1688_s12 }
  0x80   :  { %v469_v24 = vstv %s1314_s18 }
  0x81   :  { %p1695_p12 = por %p1694_p11, %p1693_p10 }
  0x82   :  { %v464_v22 = vstv %s463_s4 }
  0x83   :  { %v465_v23 = vsel %vm461_vm3, %v464_v22, 0  ;;  %v1734_v22 = vmov 0.0|0.0   ;;  %p1696_p13 = pnand %p1695_p12, %p1689_p9 }
  0x84   :  { %v470_v28 = vsel %vm466_vm4, %v469_v24, %v465_v23  ;;  %v932_v24 = vld [vmem:[#allocation10 + $0x10] sm:$0xff] }
  0x85   :  { %1473 = vmatpush3.bf16.xpose.msk.msra.mxu0 %vm1913_vm1, %v1468_v7  ;;  %vm471_vm5 = vcmp.lt.s32.totalorder %v458_v27, %v470_v28  ;;  %v1491_v26 = vpack.c.bf16 %v933_v25, %v932_v24 }
  0x86   :  { %1485 = vmatpush3.bf16.xpose.msk.msra.mxu1 %vm1913_vm1, %v1468_v7  ;;  %1419 = vmatprep.subr.mxu0 %v1731_v11  ;;  %v1315_v31 = vsel %vm471_vm5, 1.0, %v1731_v11 }
  0x87   :  { %1399 = vmatprep.subr.mxu1 %v1731_v11  ;;  %v481_v32 = vrot.slane %v1315_v31, %v1967_v30 }
  0x89   :  { %v489_v33 = vrot.slane %v481_v32, %v1967_v30  ;;  %v482_v35 = vcombine.high %v481_v32, %v481_v32 }
  0x8b   :  { %v500_v36 = vrot.slane %v489_v33, %v499_v34  ;;  %v496_v37 = vrot.slane %v482_v35, %v1967_v30 }
  0x8c   :  { %1386 = vmatmul.mubr.msk.f32.vlgmr.msra.gmra.mrb[0].mxu0 %vm136_vm0, %v1934_v8 }
  0x8d   :  { %1397 = vmatmul.mubr.msk.f32.vlgmr.msra.gmra.mrb[0].mxu1 %vm136_vm0, %v122_v10  ;;  %1421 = vmatprep.mubr.msk.f32.mxu0 %vm1732_vm2, %v1731_v11  ;;  %v504_v41 = vrot.slane %v496_v37, %v499_v34 }
  0x8e   :  { %1401 = vmatprep.mubr.msk.f32.mxu1 %vm1732_vm2, %v1731_v11 }
 0x15f   :  { %v1387_v13 = vpop.f32.mrb[0].mxu0 }
 0x160   :  { %v221_v14 = vpop.f32.mrb[1].mxu0  ;;  %v227_v16 = vadd.f32 %v1387_v13, %v1949_v12  ;;  %v1964_v17 = vpop.f32.mrb[0].mxu1 }
 0x161   :  { %v222_v15 = vadd.f32 %v1949_v12, %v221_v14  ;;  %v302_v18 = vpop.f32.mrb[1].mxu1 }
 0x162   :  { %v303_v19 = vadd.f32 %v1949_v12, %v302_v18  ;;  %v930_v18 = vld [vmem:[#allocation10] sm:$0xff] }
 0x163   :  { %1400 = vmatpush3.xpose.msk.msra.mxu1 %vm136_vm0, %v222_v15  ;;  %v308_v15 = vadd.f32 %v1964_v17, %v1949_v12 }
 0x164   :  { %1404 = vmatprep.subr.mxu1 %v1731_v11  ;;  %1420 = vmatpush3.msra.mxu0 %v303_v19  ;;  %v931_v19 = vld [vmem:[#allocation10 + $0x8] sm:$0xff] }
 0x165   :  { %v1487_v20 = vpack.c.bf16 %v931_v19, %v930_v18  ;;  %1486 = vmatprep.subr.bf16.mxu0 %v1734_v22 }
 0x166   :  { %1402 = vmatmul.mubr.msk.f32.vlgmr.msra.gmra.mrb[2].mxu1 %vm136_vm0, %v121_v9 }
 0x167   :  { %1405 = vmatpush3.xpose.msk.msra.mxu1 %vm136_vm0, %v227_v16  ;;  %1406 = vmatprep.mubr.msk.f32.mxu1 %vm1732_vm2, %v1731_v11 }
 0x168   :  { %1409 = vmatprep.subr.mxu1 %v1731_v11 }
 0x16a   :  { %1407 = vmatmul.mubr.msk.f32.vlgmr.msra.gmra.mrb[4].mxu1 %vm136_vm0, %v122_v10 }
 0x16b   :  { %1410 = vmatpush3.msra.mxu1 %v123_v6  ;;  %1411 = vmatprep.mubr.msk.f32.mxu1 %vm1732_vm2, %v1731_v11 }
 0x16c   :  { %1414 = vmatprep.subr.mxu1 %v1731_v11 }
 0x239   :  { %v380_v38 = vpop.f32.mrb[2].mxu1 }
 0x23a   :  { %v507_v39 = vmul.f32 %v500_v36, %v380_v38  ;;  %v1403_v40 = vpop.f32.mrb[3].mxu1 }
 0x23c   :  { %v510_v42 = vsel %vm509_vm6, %v507_v39, -inf }
 0x23d   :  { %511 = vmax.xlane.f32.xlu0 %v510_v42  ;;  %v453_v43 = vpop.f32.mrb[4].mxu1 }
 0x23e   :  { %v508_v44 = vmul.f32 %v504_v41, %v453_v43  ;;  %v1408_v45 = vpop.f32.mrb[5].mxu1 }
 0x240   :  { %v513_v46 = vsel %vm509_vm6, %v508_v44, -inf }
 0x241   :  { %514 = vmax.xlane.f32.xlu0 %v513_v46 }
 0x2ca   :  { %v512_v47 = vpop.xlane.xlu0 %511 }
 0x2cb   :  { %v516_v48 = vsub.f32 %v507_v39, %v512_v47  ;;  %v1029_v47 = vld [vmem:[#allocation12] sm:$0xff] }
 0x2cd   :  { %v518_v49 = vmul.f32 1.442695, %v516_v48  ;;  %v1030_v48 = vld [vmem:[#allocation12 + $0x8] sm:$0xff] }
 0x2ce   :  { %v515_v50 = vpop.xlane.xlu0 %514 }
 0x2cf   :  { %1530 = vpow2.f32 %v518_v49  ;;  %v517_v51 = vsub.f32 %v508_v44, %v515_v50 }
 0x2d1   :  { %v520_v52 = vmul.f32 1.442695, %v517_v51 }
 0x2d3   :  { %1532 = vpow2.f32 %v520_v52 }
 0x2d9   :  { %v1531_v53 = vpop.eup %1530 }
 0x2da   :  { %v522_v54 = vsel %vm509_vm6, %v1531_v53, 0.0 }
 0x2db   :  { %523 = vadd.xlane.f32.xlu1 %v522_v54  ;;  %v1495_v54 = vpack.c.bf16 %v1030_v48, %v1029_v47 }
 0x2dd   :  { %v1533_v55 = vpop.eup %1532 }
 0x2de   :  { %v525_v56 = vsel %vm509_vm6, %v1533_v55, 0.0 }
 0x2df   :  { %526 = vadd.xlane.f32.xlu1 %v525_v56 }
 0x368   :  { %v524_v57 = vpop.xlane.xlu1 %523 }
 0x369   :  { %1534 = vrcp.f32 %v524_v57 }
 0x36c   :  { %v527_v58 = vpop.xlane.xlu1 %526 }
 0x36d   :  { %1536 = vrcp.f32 %v527_v58  ;;  %v1031_v58 = vld [vmem:[#allocation12 + $0x10] sm:$0xff] }
 0x373   :  { %v1535_v59 = vpop.eup %1534 }
 0x374   :  { %v530_v60 = vmul.f32 %v1535_v59, %v1531_v53  ;;  %v1032_v59 = vld [vmem:[#allocation12 + $0x18] sm:$0xff] }
 0x376   :  { %v532_v61 = vmul.f32 %v530_v60, %v500_v36 }
 0x377   :  { %v1537_v62 = vpop.eup %1536 }
 0x378   :  { %v534_v63 = vsel %vm509_vm6, %v532_v61, 0.0  ;;  %v531_v1 = vmul.f32 %v1537_v62, %v1533_v55  ;;  %v1499_v62 = vpack.c.bf16 %v1032_v59, %v1031_v58 }
 0x379   :  { %535 = vadd.xlane.f32.xlu0 %v534_v63 }
 0x37a   :  { %v533_v2 = vmul.f32 %v531_v1, %v504_v41 }
 0x37c   :  { %v537_v3 = vsel %vm509_vm6, %v533_v2, 0.0 }
 0x37d   :  { %538 = vadd.xlane.f32.xlu1 %v537_v3 }
 0x406   :  { %v536_v4 = vpop.xlane.xlu0 %535 }
 0x407   :  { %v540_v5 = vadd.f32 1e-13, %v536_v4 }
 0x409   :  { %1538 = vrcp.f32 %v540_v5  ;;  %v1150_v5 = vld [vmem:[%s2061_s9 + $0x8] sm:$0xff] }
 0x40a   :  { %v539_v6 = vpop.xlane.xlu1 %538 }
 0x40b   :  { %v541_v7 = vadd.f32 1e-13, %v539_v6 }
 0x40d   :  { %1540 = vrcp.f32 %v541_v7  ;;  %v1151_v7 = vld [vmem:[%s2061_s9 + $0x10] sm:$0xff] }
 0x413   :  { %v1539_v9 = vpop.eup %1538 }
 0x414   :  { %v543_v10 = vmul.f32 %v1539_v9, %v532_v61  ;;  %v1152_v9 = vld [vmem:[%s2061_s9 + $0x18] sm:$0xff] }
 0x416   :  { %706 = vxpose.xlu0.b32.start.end [1/1] (short) (narrow) %v543_v10, 8  ;;  %1412 = vmatmul.mubr.msk.f32.vlgmr.msra.gmra.mrb[6].mxu1 %vm509_vm6, %v543_v10  ;;  %v1507_v10 = vpack.c.bf16 %v1152_v9, %v1151_v7 }
 0x417   :  { %v1541_v13 = vpop.eup %1540  ;;  %1415 = vmatpush3.msra.mxu1 %v1934_v8  ;;  %1416 = vmatprep.mubr.msk.f32.mxu1 %vm1732_vm2, %v1731_v11 }
 0x418   :  { %1424 = vmatprep.subr.mxu1 %v1731_v11  ;;  %v545_v14 = vmul.f32 %v1541_v13, %v533_v2  ;;  %v1320_v13 = vld [vmem:[%s2058_s6] ss:$0 sm:$0xff] }
 0x41a   :  { %811 = vxpose.xlu1.b32.start.end [1/1] (short) (narrow) %v545_v14, 8  ;;  %1417 = vmatmul.mubr.msk.f32.vlgmr.msra.gmra.mrb[8].mxu1 %vm509_vm6, %v545_v14  ;;  %v1326_v14 = vld [vmem:[#allocation13] ss:$0 sm:$0xff] }
 0x41b   :  { %1425 = vmatpush3.msra.mxu1 %v308_v15  ;;  %1426 = vmatprep.mubr.msk.f32.mxu1 %vm1732_vm2, %v1731_v11  ;;  %v1510_v15 = vadd.f32 %v1326_v14, %v1320_v13 }
 0x41c   :  { %1502 = vmatprep.subr.bf16.mxu1 %v1734_v22 }
 0x496   :  { %v722_v16 = vpop.trf.xlu0 }
 0x497   :  { %1422 = vmatmul.mubr.msk.f32.vlgmr.msra.gmra.mrb[2].mxu0 %vm509_vm6, %v722_v16 }
 0x498   :  { %1437 = vmatprep.mubr.msk.f32.mxu0 %vm1732_vm2, %v1731_v11  ;;  %1489 = vmatpush3.bf16.xpose.msk.msra.mxu0 %vm1913_vm1, %v1487_v20 }
 0x499   :  { %1490 = vmatprep.subr.bf16.mxu0 %v1734_v22 }
 0x49a   :  { %v827_v8 = vpop.trf.xlu1 }
 0x49b   :  { %1427 = vmatmul.mubr.msk.f32.vlgmr.msra.gmra.mrb[10].mxu1 %vm509_vm6, %v827_v8 }
 0x49c   :  { %1459 = vmatprep.mubr.msk.f32.mxu1 %vm1732_vm2, %v1731_v11 }
 0x4a0   :  { %1493 = vmatpush3.bf16.xpose.msk.msra.mxu0 %vm1913_vm1, %v1491_v26 }
 0x4a1   :  { %1494 = vmatprep.subr.bf16.mxu0 %v1734_v22 }
 0x4e9   :  { %v615_v12 = vpop.f32.mrb[6].mxu1 }
 0x4ea   :  { %v1413_v17 = vpop.f32.mrb[7].mxu1  ;;  %v692_v41 = vsel %vm136_vm0, %v615_v12, -inf }
 0x4eb   :  { %v693_v44 = vrot.slane %v692_v41, 4 }
 0x4ed   :  { %v688_v21 = vpop.f32.mrb[8].mxu1  ;;  %v694_v51 = vmax.f32 %v692_v41, %v693_v44 }
 0x4ee   :  { %v1418_v23 = vpop.f32.mrb[9].mxu1  ;;  %v699_v38 = vsel %vm136_vm0, %v688_v21, -inf }
 0x4ef   :  { %v700_v42 = vrot.slane %v699_v38, 4  ;;  %v695_v57 = vrot.slane %v694_v51, 2 }
 0x4f1   :  { %v701_v49 = vmax.f32 %v699_v38, %v700_v42  ;;  %v696_v61 = vmax.f32 %v694_v51, %v695_v57 }
 0x4f3   :  { %v702_v55 = vrot.slane %v701_v49, 2  ;;  %v697_v1 = vrot.slane %v696_v61, 1 }
 0x4f5   :  { %v703_v60 = vmax.f32 %v701_v49, %v702_v55  ;;  %v698_v3 = vmax.f32 %v696_v61, %v697_v1 }
 0x4f7   :  { %v704_v63 = vrot.slane %v703_v60, 1 }
 0x4f9   :  { %v705_v2 = vmax.f32 %v703_v60, %v704_v63 }
 0x4fb   :  { %v1042_v4 = vsel %vm943_vm7, %v705_v2, %v698_v3 }
 0x56a   :  { %v807_v27 = vpop.f32.mrb[2].mxu0 }
 0x56b   :  { %v916_v28 = vsel %vm136_vm0, %v807_v27, -inf  ;;  %v1423_v29 = vpop.f32.mrb[3].mxu0 }
 0x56c   :  { %v917_v31 = vrot.slane %v916_v28, 4 }
 0x56e   :  { %v918_v32 = vmax.f32 %v916_v28, %v917_v31  ;;  %v912_v33 = vpop.f32.mrb[10].mxu1 }
 0x56f   :  { %v923_v34 = vsel %vm136_vm0, %v912_v33, -inf  ;;  %v1428_v35 = vpop.f32.mrb[11].mxu1  ;;  %v1332_v33 = vld [vmem:[%s2062_s10] ss:$0 sm:$0xff] }
 0x570   :  { %v919_v36 = vrot.slane %v918_v32, 2  ;;  %v924_v37 = vrot.slane %v923_v34, 4 }
 0x572   :  { %v920_v39 = vmax.f32 %v918_v32, %v919_v36  ;;  %v925_v40 = vmax.f32 %v923_v34, %v924_v37 }
 0x574   :  { %v926_v43 = vrot.slane %v925_v40, 2  ;;  %v921_v45 = vrot.slane %v920_v39, 1 }
 0x576   :  { %v927_v46 = vmax.f32 %v925_v40, %v926_v43  ;;  %v922_v52 = vmax.f32 %v920_v39, %v921_v45 }
 0x578   :  { %v928_v50 = vrot.slane %v927_v46, 1 }
 0x57a   :  { %v929_v53 = vmax.f32 %v927_v46, %v928_v50 }
 0x57c   :  { %v944_v56 = vsel %vm943_vm7, %v929_v53, %v922_v52 }
 0x57d   :  { %1438 = vmatmul.mubr.msk.f32.vlgmr.msra.gmra.mrb[4].mxu0 %vm136_vm0, %v944_v56 }
 0x57e   :  { %1497 = vmatpush3.bf16.xpose.msk.msra.mxu0 %vm1913_vm1, %v1495_v54  ;;  %1448 = vmatprep.mubr.msk.f32.mxu0 %vm1732_vm2, %v1731_v11  ;;  %v1149_v11 = vld [vmem:[%s2061_s9] sm:$0xff] }
 0x57f   :  { %1498 = vmatprep.subr.bf16.mxu0 %v1734_v22  ;;  %v1503_v6 = vpack.c.bf16 %v1150_v5, %v1149_v11 }
 0x581   :  { %1505 = vmatpush3.bf16.xpose.msk.msra.mxu1 %vm1913_vm1, %v1503_v6 }
 0x582   :  { %1506 = vmatprep.subr.bf16.mxu1 %v1734_v22 }
 0x586   :  { %1501 = vmatpush3.bf16.xpose.msk.msra.mxu0 %vm1913_vm1, %v1499_v62 }
 0x589   :  { %1509 = vmatpush3.bf16.xpose.msk.msra.mxu1 %vm1913_vm1, %v1507_v10 }
 0x58d   :  { %1449 = vmatmul.mubr.msk.f32.vlgmr.msra.gmra.mrb[4].mxu0 %vm136_vm0, %v1042_v4 }
 0x660   :  { %v1123_v16 = vpop.f32.mrb[4].mxu0 }
 0x661   :  { %v1511_v8 = vadd.f32 %v1510_v15, %v1123_v16  ;;  %v1450_v12 = vpop.f32.mrb[5].mxu0 }
 0x663   :  { %v1128_v17 = vsub.f32 0.0, %v1511_v8 }
 0x665   :  { %v1129_v18 = vmul.f32 1.442695, %v1128_v17 }
 0x667   :  { %1542 = vpow2.f32 %v1129_v18 }
 0x671   :  { %v1543_v19 = vpop.eup %1542 }
 0x672   :  { %v1131_v20 = vadd.f32 1.0, %v1543_v19 }
 0x674   :  { %1544 = vrcp.f32 %v1131_v20 }
 0x67e   :  { %v1545_v21 = vpop.eup %1544 }
 0x67f   :  { %v1135_v22 = vrot.slane %v1545_v21, 1  ;;  %v1140_v23 = vsub.f32 1.0, %v1545_v21  ;;  %v1138_v27 = vmul.f32 %v1545_v21, %v698_v3 }
 0x681   :  { %v1142_v0 = vrot.slane %v1140_v23, 1  ;;  %v1139_v24 = vmul.f32 %v1135_v22, %v705_v2  ;;  %v1145_v25 = vmul.f32 %v1140_v23, %v922_v52 }
 0x683   :  { %v1146_v26 = vmul.f32 %v1142_v0, %v929_v53  ;;  %v1147_v29 = vadd.f32 %v1145_v25, %v1138_v27 }
 0x685   :  { %v1148_v28 = vadd.f32 %v1146_v26, %v1139_v24 }
 0x687   :  { %v1162_v31 = vrot.slane %v1148_v28, 7 }
 0x689   :  { %v1163_v32 = vsel %vm943_vm7, %v1162_v31, %v1147_v29 }
 0x68a   :  { %1460 = vmatmul.mubr.msk.f32.vlgmr.msra.gmra.mrb[12].mxu1 %vm136_vm0, %v1163_v32 }
 0x75d   :  { %v1244_v34 = vpop.f32.mrb[12].mxu1 }
 0x75e   :  { %v1245_v35 = vadd.f32 %v1332_v33, %v1244_v34  ;;  %v1461_v36 = vpop.f32.mrb[13].mxu1 }
 0x760   :  { %v1248_v37 = vmax.f32 %v1245_v35, 0.0 }
 0x762   :  { %v1256_v38 = vrot.slane %v1248_v37, %v1967_v30 }
 0x764   :  { %v1257_v39 = vcombine.high %v1256_v38, %v1256_v38  ;;  %v1264_v40 = vrot.slane %v1256_v38, %v1967_v30 }
 0x766   :  { %v1271_v41 = vrot.slane %v1257_v39, %v1967_v30  ;;  %1275 = vst.msk [vmem:[#allocation15] sm:$0x1] %vm1274_vm8, %v1264_v40 }
 0x768   :  { %1276 = vst.msk [vmem:[#allocation15 + $0x1] sm:$0x1] %vm1274_vm8, %v1271_v41 }
 0x769   :  { %1699 = shalt.err (!%p1696_p13)
}
 0x76a   :  { %s1700_s2 = scalar_lea.hbm %s2063_s11, 32 }
 0x76b   :  { %p1701_p0 = scmp.ne.s32.totalorder %s2063_s11, %s1700_s2  ;;  %p1704_p1 = scmp.lt.u32.totalorder %s1700_s2, %s2063_s11 }
 0x76d   :  { %p1706_p2 = pnand %p1704_p1, %p1701_p0 }
 0x76f   :  { %1709 = shalt.err (!%p1706_p2)
}
 0x770   :  { %s1736_s0 = smov 16   ;;  %s1737_s17 = smov 1  }
 0x771   :  { %1288 = dma.vmem_to_hbm [thread:$0]  %s1283_s29, 32, %s2063_s11, [#allocation6], %s1736_s0, %s1736_s0, %s1737_s17  }
 0x772   :  { %1720 = dma.done.wait [#allocation6], 32  }
 0x773   :  { %1721 = vsyncadd [#allocation6], 4294967264 }
 0x774   :  { %1292 = vsyncpa [#allocation5], 1 }
 0x775   :  { %1293 = vsyncpa [#allocation8], 1 }
 0x776   :  { %1294 = vsyncpa [#allocation11], 1 }
 0x777   :  { %1295 = vsyncpa [#allocation14], 1 }
 0x778   :  { %1296 = vsyncpa [#allocation6], 1 }

</bundles_post_ra>
